<compile_context>
chip_gen: v7x
topology: tpu7x:2x2x1
jax: 0.10.0
libtpu: 0.0.40
codegen_flags: <defaults>
</compile_context>

<pallas_src>
import functools

import jax
import jax.numpy as jnp
from jax.experimental import pallas as pl
from jax.experimental.pallas import tpu as pltpu


_LANE = 128
_FUSED_VMEM_BUDGET = 40 * 1024 * 1024      # stay well under v7x's 64 MiB / TC


def _round_up(x, m):
    return (x + m - 1) // m * m


def _pad_2d(a, rows, cols):
    r, c = a.shape
    if r == rows and c == cols:
        return a
    return jnp.zeros((rows, cols), a.dtype).at[:r, :c].set(a)


def _pick_tile(dim, candidates):
    for c in candidates:
        if dim % c == 0:
            return c
    return dim  # dim is always a multiple of 128, so this is unreachable


def _vmem_limit_bytes(estimate):
    return int(min(max(2 * estimate, 32 * 1024 * 1024), 56 * 1024 * 1024))


# ---------------------------------------------------------------------------
# Fused whole-MLP kernel: one batch tile per grid step, all layers unrolled.
# ---------------------------------------------------------------------------
def _fused_mlp_kernel(x_ref, *rest, relu_flags):
    n_layers = len(relu_flags)
    o_ref = rest[-1]
    h = x_ref[...]
    for i in range(n_layers):
        w = rest[2 * i][...]
        b = rest[2 * i + 1][...]                 # (1, Dout) f32, broadcasts
        y = jnp.dot(h.astype(w.dtype), w, preferred_element_type=jnp.float32)
        y = y + b                                # f32 epilogue (v5e-safe)
        if relu_flags[i]:
            y = jnp.maximum(y, 0.0)
        h = y
    o_ref[...] = h.astype(o_ref.dtype)


# ---------------------------------------------------------------------------
# Per-layer K/N-tiled linear kernel (fallback for large layers).
# ---------------------------------------------------------------------------
def _tiled_linear_kernel(x_ref, w_ref, b_ref, o_ref, acc_ref, *, apply_relu):
    k = pl.program_id(2)

    @pl.when(k == 0)
    def _():
        acc_ref[...] = jnp.zeros_like(acc_ref)

    acc_ref[...] += jnp.dot(x_ref[...], w_ref[...],
                            preferred_element_type=jnp.float32)

    @pl.when(k == pl.num_programs(2) - 1)
    def _():
        y = acc_ref[...] + b_ref[...]
        if apply_relu:
            y = jnp.maximum(y, 0.0)
        o_ref[...] = y.astype(o_ref.dtype)


def _linear_tiled(x, w, b, *, apply_relu, tile_m, out_dtype):
    """x: (B, K), w: (K, N), b: (1, N) -> (B, N); all dims multiples of 128."""
    B, K = x.shape
    _, N = w.shape
    tn = _pick_tile(N, (512, 256, 128))
    tk = _pick_tile(K, (1024, 512, 256, 128))
    cbytes = x.dtype.itemsize
    obytes = jnp.dtype(out_dtype).itemsize
    vmem_est = (2 * (tile_m * tk + tk * tn) * cbytes
                + 2 * tile_m * tn * obytes + tile_m * tn * 4 + 2 * tn * 4)
    kernel = functools.partial(_tiled_linear_kernel, apply_relu=apply_relu)
    return pl.pallas_call(
        kernel,
        out_shape=jax.ShapeDtypeStruct((B, N), out_dtype),
        grid_spec=pltpu.PrefetchScalarGridSpec(
            num_scalar_prefetch=0,
            grid=(B // tile_m, N // tn, K // tk),
            in_specs=[
                pl.BlockSpec((tile_m, tk), lambda i, j, k: (i, k)),
                pl.BlockSpec((tk, tn), lambda i, j, k: (k, j)),
                pl.BlockSpec((1, tn), lambda i, j, k: (0, j)),
            ],
            out_specs=pl.BlockSpec((tile_m, tn), lambda i, j, k: (i, j)),
            scratch_shapes=[pltpu.VMEM((tile_m, tn), jnp.float32)],
        ),
        compiler_params=pltpu.CompilerParams(
            dimension_semantics=("parallel", "parallel", "arbitrary"),
            vmem_limit_bytes=_vmem_limit_bytes(vmem_est)),
        cost_estimate=pl.CostEstimate(
            flops=2 * B * K * N,
            transcendentals=0,
            bytes_accessed=(B * K * cbytes + K * N * w.dtype.itemsize
                            + N * 4 + B * N * obytes)),
    )(x, w, b)


# ---------------------------------------------------------------------------
# MLP module (JAX/Pallas equivalent of the PyTorch module).
# ---------------------------------------------------------------------------
class MLP:
    def __init__(self, hidden_size, last_activation=True, key=None,
                 compute_dtype=jnp.float32, tile_m=128,
                 max_fused_vmem_bytes=_FUSED_VMEM_BUDGET):
        if key is None:
            key = jax.random.PRNGKey(0)
        self.hidden_size = tuple(int(d) for d in hidden_size)
        self.last_activation = bool(last_activation)
        self.compute_dtype = compute_dtype
        self.tile_m = int(tile_m)
        self.max_fused_vmem_bytes = int(max_fused_vmem_bytes)

        n_layers = len(self.hidden_size) - 1
        self.relu_flags = tuple(
            (i < n_layers - 1) or (i == n_layers - 1 and self.last_activation)
            for i in range(n_layers))

        # Lane-dense padded dims (multiples of 128).
        self.dims_pad = tuple(_round_up(d, _LANE) for d in self.hidden_size)

        # Raw f32 params (nn.Linear-style init, stored as (in, out)).
        self.params = []
        for i in range(n_layers):
            in_dim, out_dim = self.hidden_size[i], self.hidden_size[i + 1]
            key, kw, kb = jax.random.split(key, 3)
            bound = 1.0 / jnp.sqrt(jnp.float32(in_dim))
            w = jax.random.uniform(kw, (in_dim, out_dim), jnp.float32,
                                   minval=-bound, maxval=bound)
            b = jax.random.uniform(kb, (out_dim,), jnp.float32,
                                   minval=-bound, maxval=bound)
            self.params.append((w, b))

        # Padded params: weights in compute dtype, biases (1, Dp) in f32.
        self.padded_params = []
        for i, (w, b) in enumerate(self.params):
            dp_in, dp_out = self.dims_pad[i], self.dims_pad[i + 1]
            w_pad = _pad_2d(w, dp_in, dp_out).astype(self.compute_dtype)
            b_pad = _pad_2d(b.reshape(1, -1), 1, dp_out).astype(jnp.float32)
            self.padded_params.append((w_pad, b_pad))

    # -- VMEM estimate for the fused kernel ---------------------------------
    def _fused_vmem_estimate(self):
        dims = self.dims_pad
        cbytes = jnp.dtype(self.compute_dtype).itemsize
        tm = self.tile_m
        est = 2 * tm * dims[0] * cbytes            # x tile, double-buffered
        est += 2 * tm * dims[-1] * 4               # out tile (f32)
        for i in range(len(dims) - 1):
            est += 2 * (dims[i] * dims[i + 1] * cbytes + dims[i + 1] * 4)
            est += tm * dims[i + 1] * 4            # live f32 activation value
        return est

    # -- forward paths -------------------------------------------------------
    def _forward_fused(self, x_pad):
        B_pad = x_pad.shape[0]
        dims = self.dims_pad
        n_layers = len(self.padded_params)

        in_specs = [pl.BlockSpec((self.tile_m, dims[0]), lambda i: (i, 0))]
        args = [x_pad]
        for li, (w_pad, b_pad) in enumerate(self.padded_params):
            in_specs.append(
                pl.BlockSpec((dims[li], dims[li + 1]), lambda i: (0, 0)))
            in_specs.append(
                pl.BlockSpec((1, dims[li + 1]), lambda i: (0, 0)))
            args.extend([w_pad, b_pad])
        out_specs = pl.BlockSpec((self.tile_m, dims[-1]), lambda i: (i, 0))

        cbytes = jnp.dtype(self.compute_dtype).itemsize
        flops = 2 * B_pad * sum(dims[i] * dims[i + 1] for i in range(n_layers))
        bytes_accessed = B_pad * dims[0] * cbytes + B_pad * dims[-1] * 4
        for w_pad, b_pad in self.padded_params:
            bytes_accessed += w_pad.size * w_pad.dtype.itemsize + b_pad.size * 4

        kernel = functools.partial(_fused_mlp_kernel,
                                   relu_flags=self.relu_flags)
        return pl.pallas_call(
            kernel,
            out_shape=jax.ShapeDtypeStruct((B_pad, dims[-1]), jnp.float32),
            grid_spec=pltpu.PrefetchScalarGridSpec(
                num_scalar_prefetch=0,
                grid=(B_pad // self.tile_m,),
                in_specs=in_specs,
                out_specs=out_specs,
            ),
            compiler_params=pltpu.CompilerParams(
                dimension_semantics=("parallel",),
                vmem_limit_bytes=_vmem_limit_bytes(self._fused_vmem_estimate())),
            cost_estimate=pl.CostEstimate(
                flops=flops, transcendentals=0, bytes_accessed=bytes_accessed),
        )(*args)

    def _forward_tiled(self, x_pad):
        h = x_pad
        n_layers = len(self.padded_params)
        for li, (w_pad, b_pad) in enumerate(self.padded_params):
            is_last = (li == n_layers - 1)
            out_dtype = jnp.float32 if is_last else self.compute_dtype
            h = _linear_tiled(h, w_pad, b_pad,
                              apply_relu=self.relu_flags[li],
                              tile_m=self.tile_m, out_dtype=out_dtype)
        return h

    def __call__(self, x):
        orig_shape = x.shape
        d_in = orig_shape[-1]
        assert d_in == self.hidden_size[0]
        x2 = x.reshape(-1, d_in)
        B = x2.shape[0]
        B_pad = _round_up(max(B, 1), self.tile_m)

        x_pad = jnp.zeros((B_pad, self.dims_pad[0]), self.compute_dtype)
        x_pad = x_pad.at[:B, :d_in].set(x2.astype(self.compute_dtype))

        if self._fused_vmem_estimate() <= self.max_fused_vmem_bytes:
            out_pad = self._forward_fused(x_pad)
        else:
            out_pad = self._forward_tiled(x_pad)

        d_out = self.hidden_size[-1]
        out = out_pad[:B, :d_out].astype(x.dtype)
        return out.reshape(*orig_shape[:-1], d_out)


def _reference_forward(mlp: MLP, x):
    """Plain-JAX f32 reference for verification."""
    h = x.reshape(-1, x.shape[-1]).astype(jnp.float32)
    for i, (w, b) in enumerate(mlp.params):
        h = h @ w + b
        if mlp.relu_flags[i]:
            h = jnp.maximum(h, 0.0)
    return h.reshape(*x.shape[:-1], mlp.hidden_size[-1])


if __name__ == "__main__":
    key = jax.random.PRNGKey(0)
    k_in1, k_p1, k_in2, k_p2, k_p3 = jax.random.split(key, 5)

    # --- Test 1: tiny MLP (as in the VAE), f32 compute, fused kernel -------
    hidden_size = (16, 32, 8)
    batch = 8
    x1 = jax.random.normal(k_in1, (batch, hidden_size[0]), jnp.float32)
    mlp1 = MLP(hidden_size, last_activation=True, key=k_p1)
    out1 = jax.block_until_ready(mlp1(x1))
    ref1 = _reference_forward(mlp1, x1)
    assert out1.shape == (batch, hidden_size[-1])
    assert jnp.allclose(out1, ref1, atol=1e-5, rtol=1e-5)

    # --- Test 2: larger MLP, bf16 matmul operands (f32 accumulation) -------
    hidden_size2 = (256, 512, 128)
    batch2 = 256
    x2 = jax.random.normal(k_in2, (batch2, hidden_size2[0]), jnp.float32)
    mlp2 = MLP(hidden_size2, last_activation=False, key=k_p2,
               compute_dtype=jnp.bfloat16)
    out2 = jax.block_until_ready(mlp2(x2))
    ref2 = _reference_forward(mlp2, x2)
    assert out2.shape == (batch2, hidden_size2[-1])
    rel_err = jnp.max(jnp.abs(out2 - ref2)) / jnp.max(jnp.abs(ref2))
    assert rel_err < 5e-2, f"bf16 path rel_err={rel_err}"

    # --- Test 3: force the per-layer K/N-tiled fallback path, f32 ----------
    mlp3 = MLP(hidden_size2, last_activation=True, key=k_p3,
               compute_dtype=jnp.float32, max_fused_vmem_bytes=0)
    out3 = jax.block_until_ready(mlp3(x2))
    ref3 = _reference_forward(mlp3, x2)
    assert out3.shape == (batch2, hidden_size2[-1])
    assert jnp.allclose(out3, ref3, atol=1e-4, rtol=1e-4)

    print("KERNEL_OK")
</pallas_src>

<mosaic_0001>
module attributes {stable_mosaic.version = 11 : i64} {
  func.func @_fused_mlp_kernel(%arg0: i32, %arg1: memref<128x128xf32, #tpu.memory_space<vmem>>, %arg2: memref<128x128xf32, #tpu.memory_space<vmem>>, %arg3: memref<1x128xf32, #tpu.memory_space<vmem>>, %arg4: memref<128x128xf32, #tpu.memory_space<vmem>>, %arg5: memref<1x128xf32, #tpu.memory_space<vmem>>, %arg6: memref<128x128xf32, #tpu.memory_space<vmem>>) attributes {dimension_semantics = [#tpu.dimension_semantics<parallel>], iteration_bounds = array<i64: 1>, scalar_prefetch = 0 : i64, scratch_operands = 0 : i64, tpu.core_type = #tpu.core_type<tc>, window_params = [{transform_indices = @transform_0, window_bounds = array<i64: 128, 128>}, {pipeline_mode = #tpu.pipeline_mode<synchronous>, transform_indices = @transform_1, window_bounds = array<i64: 128, 128>}, {pipeline_mode = #tpu.pipeline_mode<synchronous>, transform_indices = @transform_2, window_bounds = array<i64: 1, 128>}, {pipeline_mode = #tpu.pipeline_mode<synchronous>, transform_indices = @transform_3, window_bounds = array<i64: 128, 128>}, {pipeline_mode = #tpu.pipeline_mode<synchronous>, transform_indices = @transform_4, window_bounds = array<i64: 1, 128>}, {transform_indices = @transform_5, window_bounds = array<i64: 128, 128>}]} {
    %c0 = arith.constant 0 : index
    %c0_0 = arith.constant 0 : index
    %0 = vector.load %arg1[%c0, %c0_0] : memref<128x128xf32, #tpu.memory_space<vmem>>, vector<128x128xf32>
    %c0_1 = arith.constant 0 : index
    %c0_2 = arith.constant 0 : index
    %1 = vector.load %arg2[%c0_1, %c0_2] : memref<128x128xf32, #tpu.memory_space<vmem>>, vector<128x128xf32>
    %c0_3 = arith.constant 0 : index
    %c0_4 = arith.constant 0 : index
    %2 = vector.load %arg3[%c0_3, %c0_4] : memref<1x128xf32, #tpu.memory_space<vmem>>, vector<1x128xf32>
    %cst = arith.constant dense<0.000000e+00> : vector<128x128xf32>
    %3 = tpu.matmul %0, %1, %cst {dimension_numbers = #tpu.dot_dimension_numbers<[1], [0], [0], [1], [0, 0, 1, 1], [], []>} : vector<128x128xf32>, vector<128x128xf32>, vector<128x128xf32> -> vector<128x128xf32>
    %4 = vector.broadcast %2 : vector<1x128xf32> to vector<128x128xf32>
    %5 = arith.addf %3, %4 : vector<128x128xf32>
    %cst_5 = arith.constant 0.000000e+00 : f32
    %6 = vector.broadcast %cst_5 : f32 to vector<128x128xf32>
    %7 = arith.maximumf %5, %6 : vector<128x128xf32>
    %c0_6 = arith.constant 0 : index
    %c0_7 = arith.constant 0 : index
    %8 = vector.load %arg4[%c0_6, %c0_7] : memref<128x128xf32, #tpu.memory_space<vmem>>, vector<128x128xf32>
    %c0_8 = arith.constant 0 : index
    %c0_9 = arith.constant 0 : index
    %9 = vector.load %arg5[%c0_8, %c0_9] : memref<1x128xf32, #tpu.memory_space<vmem>>, vector<1x128xf32>
    %cst_10 = arith.constant dense<0.000000e+00> : vector<128x128xf32>
    %10 = tpu.matmul %7, %8, %cst_10 {dimension_numbers = #tpu.dot_dimension_numbers<[1], [0], [0], [1], [0, 0, 1, 1], [], []>} : vector<128x128xf32>, vector<128x128xf32>, vector<128x128xf32> -> vector<128x128xf32>
    %11 = vector.broadcast %9 : vector<1x128xf32> to vector<128x128xf32>
    %12 = arith.addf %10, %11 : vector<128x128xf32>
    %cst_11 = arith.constant 0.000000e+00 : f32
    %13 = vector.broadcast %cst_11 : f32 to vector<128x128xf32>
    %14 = arith.maximumf %12, %13 : vector<128x128xf32>
    %c0_12 = arith.constant 0 : index
    %c0_13 = arith.constant 0 : index
    %15 = vector.load %arg6[%c0_12, %c0_13] : memref<128x128xf32, #tpu.memory_space<vmem>>, vector<128x128xf32>
    tpu.vector_store %arg6[%c0_12, %c0_13], %14 {strides = array<i32>} : memref<128x128xf32, #tpu.memory_space<vmem>>, vector<128x128xf32>,
    return
  }
  func.func @transform_0(%arg0: i32) -> (i32, i32) {
    %c0_i32 = arith.constant 0 : i32
    %c0_i32_0 = arith.constant 0 : i32
    return %arg0, %c0_i32 : i32, i32
  }
  func.func @transform_1(%arg0: i32) -> (i32, i32) {
    %c0_i32 = arith.constant 0 : i32
    %c0_i32_0 = arith.constant 0 : i32
    %c0_i32_1 = arith.constant 0 : i32
    return %c0_i32, %c0_i32_0 : i32, i32
  }
  func.func @transform_2(%arg0: i32) -> (i32, i32) {
    %c0_i32 = arith.constant 0 : i32
    %c0_i32_0 = arith.constant 0 : i32
    %c0_i32_1 = arith.constant 0 : i32
    return %c0_i32, %c0_i32_0 : i32, i32
  }
  func.func @transform_3(%arg0: i32) -> (i32, i32) {
    %c0_i32 = arith.constant 0 : i32
    %c0_i32_0 = arith.constant 0 : i32
    %c0_i32_1 = arith.constant 0 : i32
    return %c0_i32, %c0_i32_0 : i32, i32
  }
  func.func @transform_4(%arg0: i32) -> (i32, i32) {
    %c0_i32 = arith.constant 0 : i32
    %c0_i32_0 = arith.constant 0 : i32
    %c0_i32_1 = arith.constant 0 : i32
    return %c0_i32, %c0_i32_0 : i32, i32
  }
  func.func @transform_5(%arg0: i32) -> (i32, i32) {
    %c0_i32 = arith.constant 0 : i32
    %c0_i32_0 = arith.constant 0 : i32
    return %arg0, %c0_i32 : i32, i32
  }
}

</mosaic_0001>

<bundles_post_ra>
// kernel: tpu_custom_call.1
= control target key start
LH: loop header
LB: loop body
LE: loop exit
PB: predicated region body
PF: predicated region fallthrough
CT: control target
= control target key end

     0   :  { %10 = vsyncpa [#allocation3], 0  ;;  %s931_s0 = inlined_call_operand.hbm [shape: f32[128,128], index: 0, kind: input, shape index: {}]   ;;  %s932_s1 = inlined_call_operand.hbm [shape: f32[128,128], index: 1, kind: input, shape index: {}]   ;;  %s933_s2 = inlined_call_operand.vmem [shape: f32[1,128], index: 2, kind: input, shape index: {}]   ;;  %s934_s3 = inlined_call_operand.hbm [shape: f32[128,128], index: 3, kind: input, shape index: {}]   ;;  %s935_s4 = inlined_call_operand.vmem [shape: f32[1,128], index: 4, kind: input, shape index: {}]   ;;  %s936_s5 = inlined_call_operand.hbm [shape: f32[128,128], index: 5, kind: output, shape index: {}]  }
   0x1   :  { %11 = vsyncpa [#allocation6], 0 }
   0x2   :  { %12 = vsyncpa [#allocation4], 0  ;;  %s822_s18 = smov [#allocation5]   ;;  %s823_s20 = smov [#allocation2]  }
   0x3   :  { %s30_s19 = sshll.u32 %s822_s18, 4  ;;  %s18_s21 = sshll.u32 %s823_s20, 4  ;;  %s31_s19 = int_to_ptr.vmem [resolvable:$true] %s30_s19  ;;  %s858_s21 = int_to_ptr.vmem [resolvable:$true] %s18_s21 }
   0x4   :  { %s728_s24 = scalar_lea.hbm %s932_s1, 2048 }
   0x5   :  { %p729_p0 = scmp.ne.s32.totalorder %s932_s1, %s728_s24  ;;  %p732_p1 = scmp.lt.u32.totalorder %s728_s24, %s932_s1 }
   0x7   :  { %p734_p2 = pnand %p732_p1, %p729_p0 }
   0x9   :  { %737 = shalt.err (!%p734_p2)
}
   0xa   :  { %s738_s29 = scalar_lea.vmem %s31_s19, 2048  ;;  %p743_p4 = scmp.lt.s32.totalorder %s31_s19, %s31_s19 }
   0xb   :  { %p739_p3 = scmp.ne.s32.totalorder %s31_s19, %s738_s29  ;;  %p744_p5 = scmp.lt.s32.totalorder %s738_s29, %s738_s29 }
   0xd   :  { %p745_p6 = por %p744_p5, %p743_p4 }
   0xf   :  { %p746_p7 = pnand %p745_p6, %p739_p3 }
  0x11   :  { %749 = shalt.err (!%p746_p7)
}
  0x12   :  { %s824_s30 = smov 128   ;;  %s825_s6 = smov 8  }
  0x13   :  { %36 = dma.hbm_to_vmem [thread:$0]  %s932_s1, 2048, %s31_s19, [#allocation6], %s824_s30, %s824_s30, %s825_s6  }
  0x14   :  { %s750_s11 = scalar_lea.hbm %s931_s0, 2048 }
  0x15   :  { %p751_p8 = scmp.ne.s32.totalorder %s931_s0, %s750_s11  ;;  %p754_p9 = scmp.lt.u32.totalorder %s750_s11, %s931_s0 }
  0x17   :  { %p756_p10 = pnand %p754_p9, %p751_p8 }
  0x19   :  { %759 = shalt.err (!%p756_p10)
}
  0x1a   :  { %s760_s16 = scalar_lea.vmem %s858_s21, 2048  ;;  %p765_p12 = scmp.lt.s32.totalorder %s858_s21, %s858_s21 }
  0x1b   :  { %p761_p11 = scmp.ne.s32.totalorder %s858_s21, %s760_s16  ;;  %p766_p13 = scmp.lt.s32.totalorder %s760_s16, %s760_s16 }
  0x1d   :  { %p767_p0 = por %p766_p13, %p765_p12 }
  0x1f   :  { %p768_p1 = pnand %p767_p0, %p761_p11 }
  0x21   :  { %771 = shalt.err (!%p768_p1)
}
  0x22   :  { %24 = dma.hbm_to_vmem [thread:$0]  %s931_s0, 2048, %s858_s21, [#allocation3], %s824_s30, %s824_s30, %s825_s6  }
  0x23   :  { %s826_s18 = smov [#allocation7]   ;;  %s772_s23 = scalar_lea.hbm %s934_s3, 2048 }
  0x24   :  { %s44_s19 = sshll.u32 %s826_s18, 4  ;;  %p773_p2 = scmp.ne.s32.totalorder %s934_s3, %s772_s23  ;;  %s45_s19 = int_to_ptr.vmem [resolvable:$true] %s44_s19 }
  0x25   :  { %p776_p3 = scmp.lt.u32.totalorder %s772_s23, %s934_s3 }
  0x27   :  { %p778_p4 = pnand %p776_p3, %p773_p2 }
  0x29   :  { %781 = shalt.err (!%p778_p4)
}
  0x2a   :  { %s782_s28 = scalar_lea.vmem %s45_s19, 2048  ;;  %p787_p6 = scmp.lt.s32.totalorder %s45_s19, %s45_s19 }
  0x2b   :  { %p783_p5 = scmp.ne.s32.totalorder %s45_s19, %s782_s28  ;;  %p788_p7 = scmp.lt.s32.totalorder %s782_s28, %s782_s28 }
  0x2d   :  { %p789_p8 = por %p788_p7, %p787_p6 }
  0x2f   :  { %p790_p9 = pnand %p789_p8, %p783_p5 }
  0x31   :  { %793 = shalt.err (!%p790_p9)
}
  0x32   :  { %50 = dma.hbm_to_vmem [thread:$0]  %s934_s3, 2048, %s45_s19, [#allocation6], %s824_s30, %s824_s30, %s825_s6  }
  0x33   :  { %816 = dma.done.wait [#allocation3], 2048  }
  0x34   :  { %817 = vsyncadd [#allocation3], 4294965248 }
  0x35   :  { %818 = dma.done.wait [#allocation6], 4096  }
  0x36   :  { %819 = vsyncadd [#allocation6], 4294963200  ;;  %v78_v0 = vld [vmem:[#allocation5] sm:$0xff]  ;;  %v79_v1 = vld [vmem:[#allocation5 + $0x8] sm:$0xff] }
  0x37   :  { %v80_v2 = vld [vmem:[#allocation5 + $0x10] sm:$0xff]  ;;  %v658_v3 = vpack.c.bf16 %v79_v1, %v78_v0  ;;  %v81_v4 = vld [vmem:[#allocation5 + $0x18] sm:$0xff]  ;;  %v82_v6 = vld [vmem:[#allocation5 + $0x20] sm:$0xff] }
  0x38   :  { %v662_v5 = vpack.c.bf16 %v81_v4, %v80_v2  ;;  %v83_v7 = vld [vmem:[#allocation5 + $0x28] sm:$0xff]  ;;  %v62_v9 = vld [vmem:[#allocation2] sm:$0xff]  ;;  %v84_v10 = vld [vmem:[#allocation5 + $0x30] sm:$0xff] }
  0x39   :  { %659 = vmatprep.subr.bf16.mxu0 %v658_v3  ;;  %v666_v8 = vpack.c.bf16 %v83_v7, %v82_v6  ;;  %v85_v11 = vld [vmem:[#allocation5 + $0x38] sm:$0xff]  ;;  %578 = vmatprep.mubr.f32.mxu0 %v62_v9  ;;  %v86_v13 = vld [vmem:[#allocation5 + $0x40] sm:$0xff]  ;;  %v87_v14 = vld [vmem:[#allocation5 + $0x48] sm:$0xff] }
  0x3a   :  { %661 = vmatpush3.bf16.msra.mxu0 %v658_v3  ;;  %v670_v12 = vpack.c.bf16 %v85_v11, %v84_v10  ;;  %v262_v15 = vld [vmem:[#allocation7] sm:$0xff]  ;;  %v263_v16 = vld [vmem:[#allocation7 + $0x8] sm:$0xff]  ;;  %v264_v17 = vld [vmem:[#allocation7 + $0x10] sm:$0xff]  ;;  %v674_v21 = vpack.c.bf16 %v87_v14, %v86_v13 }
  0x3b   :  { %663 = vmatprep.subr.bf16.mxu0 %v662_v5  ;;  %v265_v18 = vld [vmem:[#allocation7 + $0x18] sm:$0xff]  ;;  %v690_v19 = vpack.c.bf16 %v263_v16, %v262_v15  ;;  %v266_v22 = vld [vmem:[#allocation7 + $0x20] sm:$0xff]  ;;  %v267_v23 = vld [vmem:[#allocation7 + $0x28] sm:$0xff] }
  0x3c   :  { %v694_v20 = vpack.c.bf16 %v265_v18, %v264_v17  ;;  %v88_v24 = vld [vmem:[#allocation5 + $0x50] sm:$0xff]  ;;  %v89_v25 = vld [vmem:[#allocation5 + $0x58] sm:$0xff]  ;;  %v698_v26 = vpack.c.bf16 %v267_v23, %v266_v22  ;;  %v90_v30 = vld [vmem:[#allocation5 + $0x60] sm:$0xff] }
  0x3d   :  { %691 = vmatprep.subr.bf16.mxu1 %v690_v19  ;;  %v678_v27 = vpack.c.bf16 %v89_v25, %v88_v24  ;;  %v268_v28 = vld [vmem:[#allocation7 + $0x30] sm:$0xff]  ;;  %v269_v29 = vld [vmem:[#allocation7 + $0x38] sm:$0xff]  ;;  %v91_v31 = vld [vmem:[#allocation5 + $0x68] sm:$0xff] }
  0x3e   :  { %665 = vmatpush3.bf16.msra.mxu0 %v662_v5  ;;  %693 = vmatpush3.bf16.msra.mxu1 %v690_v19  ;;  %v702_v32 = vpack.c.bf16 %v269_v29, %v268_v28  ;;  %v682_v33 = vpack.c.bf16 %v91_v31, %v90_v30  ;;  %v270_v34 = vld [vmem:[#allocation7 + $0x40] sm:$0xff]  ;;  %v271_v35 = vld [vmem:[#allocation7 + $0x48] sm:$0xff]  ;;  %v92_v36 = vld [vmem:[#allocation5 + $0x70] sm:$0xff] }
  0x3f   :  { %667 = vmatprep.subr.bf16.mxu0 %v666_v8  ;;  %695 = vmatprep.subr.bf16.mxu1 %v694_v20  ;;  %v93_v37 = vld [vmem:[#allocation5 + $0x78] sm:$0xff]  ;;  %v706_v38 = vpack.c.bf16 %v271_v35, %v270_v34  ;;  %v272_v40 = vld [vmem:[#allocation7 + $0x50] sm:$0xff]  ;;  %v274_v43 = vld [vmem:[#allocation7 + $0x60] sm:$0xff] }
  0x40   :  { %v686_v39 = vpack.c.bf16 %v93_v37, %v92_v36  ;;  %v273_v41 = vld [vmem:[#allocation7 + $0x58] sm:$0xff]  ;;  %v275_v44 = vld [vmem:[#allocation7 + $0x68] sm:$0xff]  ;;  %v64_v47 = vld [vmem:[#allocation2 + $0x10] sm:$0xff] }
  0x41   :  { %v710_v42 = vpack.c.bf16 %v273_v41, %v272_v40  ;;  %v63_v45 = vld [vmem:[#allocation2 + $0x8] sm:$0xff]  ;;  %v714_v46 = vpack.c.bf16 %v275_v44, %v274_v43  ;;  %v65_v48 = vld [vmem:[#allocation2 + $0x18] sm:$0xff]  ;;  %v66_v49 = vld [vmem:[#allocation2 + $0x20] sm:$0xff] }
  0x42   :  { %669 = vmatpush3.bf16.msra.mxu0 %v666_v8  ;;  %697 = vmatpush3.bf16.msra.mxu1 %v694_v20  ;;  %v67_v50 = vld [vmem:[#allocation2 + $0x28] sm:$0xff]  ;;  %v68_v51 = vld [vmem:[#allocation2 + $0x30] sm:$0xff]  ;;  %v69_v52 = vld [vmem:[#allocation2 + $0x38] sm:$0xff] }
  0x43   :  { %671 = vmatprep.subr.bf16.mxu0 %v670_v12  ;;  %699 = vmatprep.subr.bf16.mxu1 %v698_v26  ;;  %v70_v53 = vld [vmem:[#allocation2 + $0x40] sm:$0xff]  ;;  %v71_v54 = vld [vmem:[#allocation2 + $0x48] sm:$0xff]  ;;  %v72_v55 = vld [vmem:[#allocation2 + $0x50] sm:$0xff] }
  0x44   :  { %v73_v56 = vld [vmem:[#allocation2 + $0x58] sm:$0xff]  ;;  %v74_v57 = vld [vmem:[#allocation2 + $0x60] sm:$0xff]  ;;  %v75_v58 = vld [vmem:[#allocation2 + $0x68] sm:$0xff] }
  0x45   :  { %v76_v59 = vld [vmem:[#allocation2 + $0x70] sm:$0xff]  ;;  %v77_v60 = vld [vmem:[#allocation2 + $0x78] sm:$0xff]  ;;  %v480_v0 = vld [vmem:[%s933_s2] ss:$0 sm:$0xff] }
  0x46   :  { %673 = vmatpush3.bf16.msra.mxu0 %v670_v12  ;;  %701 = vmatpush3.bf16.msra.mxu1 %v698_v26  ;;  %v276_v61 = vld [vmem:[#allocation7 + $0x70] sm:$0xff]  ;;  %v277_v62 = vld [vmem:[#allocation7 + $0x78] sm:$0xff] }
  0x47   :  { %675 = vmatprep.subr.bf16.mxu0 %v674_v21  ;;  %703 = vmatprep.subr.bf16.mxu1 %v702_v32  ;;  %v718_v63 = vpack.c.bf16 %v277_v62, %v276_v61 }
  0x4a   :  { %677 = vmatpush3.bf16.msra.mxu0 %v674_v21  ;;  %705 = vmatpush3.bf16.msra.mxu1 %v702_v32 }
  0x4b   :  { %679 = vmatprep.subr.bf16.mxu0 %v678_v27  ;;  %707 = vmatprep.subr.bf16.mxu1 %v706_v38 }
  0x4e   :  { %681 = vmatpush3.bf16.msra.mxu0 %v678_v27  ;;  %709 = vmatpush3.bf16.msra.mxu1 %v706_v38 }
  0x4f   :  { %683 = vmatprep.subr.bf16.mxu0 %v682_v33  ;;  %711 = vmatprep.subr.bf16.mxu1 %v710_v42 }
  0x52   :  { %685 = vmatpush3.bf16.msra.mxu0 %v682_v33  ;;  %713 = vmatpush3.bf16.msra.mxu1 %v710_v42 }
  0x53   :  { %687 = vmatprep.subr.bf16.mxu0 %v686_v39  ;;  %715 = vmatprep.subr.bf16.mxu1 %v714_v46 }
  0x56   :  { %689 = vmatpush3.bf16.msra.mxu0 %v686_v39  ;;  %717 = vmatpush3.bf16.msra.mxu1 %v714_v46 }
  0x57   :  { %719 = vmatprep.subr.bf16.mxu1 %v718_v63 }
  0x59   :  { %579 = vmatmul.mubr.f32.vlgmr.msra.gmra.mrb[0].mxu0 %v63_v45 }
  0x5a   :  { %581 = vmatprep.mubr.f32.mxu0 %v64_v47  ;;  %721 = vmatpush3.bf16.msra.mxu1 %v718_v63 }
  0x5d   :  { %582 = vmatmul.mubr.f32.gmra.mrb[2].mxu0 %v65_v48 }
  0x5e   :  { %584 = vmatprep.mubr.f32.mxu0 %v66_v49  ;;  %v481_v49 = vld [vmem:[%s935_s4] ss:$0 sm:$0xff]  ;;  %s827_s4 = smov [#allocation8]  }
  0x5f   :  { %s467_s8 = sshll.u32 %s827_s4, 4  ;;  %s468_s8 = int_to_ptr.vmem [resolvable:$true] %s467_s8 }
  0x60   :  { %s794_s9 = scalar_lea.vmem %s468_s8, 2048  ;;  %p799_p11 = scmp.lt.s32.totalorder %s468_s8, %s468_s8 }
  0x61   :  { %585 = vmatmul.mubr.f32.gmra.mrb[4].mxu0 %v67_v50  ;;  %p795_p10 = scmp.ne.s32.totalorder %s468_s8, %s794_s9  ;;  %p800_p12 = scmp.lt.s32.totalorder %s794_s9, %s794_s9 }
  0x62   :  { %587 = vmatprep.mubr.f32.mxu0 %v68_v51 }
  0x63   :  { %p801_p13 = por %p800_p12, %p799_p11 }
  0x65   :  { %588 = vmatmul.mubr.f32.gmra.mrb[6].mxu0 %v69_v52  ;;  %p802_p0 = pnand %p801_p13, %p795_p10 }
  0x66   :  { %590 = vmatprep.mubr.f32.mxu0 %v70_v53 }
  0x69   :  { %591 = vmatmul.mubr.f32.gmra.mrb[8].mxu0 %v71_v54 }
  0x6a   :  { %593 = vmatprep.mubr.f32.mxu0 %v72_v55 }
  0x6d   :  { %594 = vmatmul.mubr.f32.gmra.mrb[10].mxu0 %v73_v56 }
  0x6e   :  { %596 = vmatprep.mubr.f32.mxu0 %v74_v57 }
  0x71   :  { %597 = vmatmul.mubr.f32.gmra.mrb[12].mxu0 %v75_v58 }
  0x72   :  { %599 = vmatprep.mubr.f32.mxu0 %v76_v59 }
  0x75   :  { %600 = vmatmul.mubr.f32.gmra.mrb[14].mxu0 %v77_v60 }
 0x12c   :  { %v580_v1 = vpop.f32.mrb[0].mxu0 }
 0x12d   :  { %v173_v2 = vadd.f32 %v580_v1, %v480_v0  ;;  %v167_v3 = vpop.f32.mrb[1].mxu0 }
 0x12e   :  { %v168_v4 = vadd.f32 %v480_v0, %v167_v3 }
 0x12f   :  { %v247_v7 = vmax.f32 %v173_v2, 0.0 }
 0x130   :  { %v583_v5 = vpop.f32.mrb[2].mxu0  ;;  %v246_v6 = vmax.f32 %v168_v4, 0.0 }
 0x131   :  { %v183_v8 = vadd.f32 %v583_v5, %v480_v0  ;;  %v177_v9 = vpop.f32.mrb[3].mxu0 }
 0x132   :  { %v178_v10 = vadd.f32 %v480_v0, %v177_v9  ;;  %634 = vmatprep.mubr.f32.mxu1 %v246_v6 }
 0x133   :  { %635 = vmatmul.mubr.f32.vlgmr.msra.gmra.mrb[0].mxu1 %v247_v7  ;;  %v249_v13 = vmax.f32 %v183_v8, 0.0 }
 0x134   :  { %v248_v11 = vmax.f32 %v178_v10, 0.0  ;;  %v586_v12 = vpop.f32.mrb[4].mxu0 }
 0x135   :  { %v193_v14 = vadd.f32 %v586_v12, %v480_v0  ;;  %v187_v15 = vpop.f32.mrb[5].mxu0 }
 0x136   :  { %v188_v16 = vadd.f32 %v480_v0, %v187_v15  ;;  %637 = vmatprep.mubr.f32.mxu1 %v248_v11 }
 0x137   :  { %638 = vmatmul.mubr.f32.gmra.mrb[2].mxu1 %v249_v13  ;;  %v251_v19 = vmax.f32 %v193_v14, 0.0 }
 0x138   :  { %v250_v17 = vmax.f32 %v188_v16, 0.0  ;;  %v589_v18 = vpop.f32.mrb[6].mxu0 }
 0x139   :  { %v203_v20 = vadd.f32 %v589_v18, %v480_v0  ;;  %v197_v21 = vpop.f32.mrb[7].mxu0 }
 0x13a   :  { %v198_v22 = vadd.f32 %v480_v0, %v197_v21  ;;  %640 = vmatprep.mubr.f32.mxu1 %v250_v17 }
 0x13b   :  { %641 = vmatmul.mubr.f32.gmra.mrb[4].mxu1 %v251_v19  ;;  %v253_v25 = vmax.f32 %v203_v20, 0.0 }
 0x13c   :  { %v252_v23 = vmax.f32 %v198_v22, 0.0  ;;  %v592_v24 = vpop.f32.mrb[8].mxu0 }
 0x13d   :  { %v213_v26 = vadd.f32 %v592_v24, %v480_v0  ;;  %v207_v27 = vpop.f32.mrb[9].mxu0 }
 0x13e   :  { %v208_v28 = vadd.f32 %v480_v0, %v207_v27  ;;  %643 = vmatprep.mubr.f32.mxu1 %v252_v23 }
 0x13f   :  { %644 = vmatmul.mubr.f32.gmra.mrb[6].mxu1 %v253_v25  ;;  %v255_v31 = vmax.f32 %v213_v26, 0.0 }
 0x140   :  { %v254_v29 = vmax.f32 %v208_v28, 0.0  ;;  %v595_v30 = vpop.f32.mrb[10].mxu0 }
 0x141   :  { %v223_v32 = vadd.f32 %v595_v30, %v480_v0  ;;  %v217_v33 = vpop.f32.mrb[11].mxu0 }
 0x142   :  { %v218_v34 = vadd.f32 %v480_v0, %v217_v33  ;;  %646 = vmatprep.mubr.f32.mxu1 %v254_v29 }
 0x143   :  { %647 = vmatmul.mubr.f32.gmra.mrb[8].mxu1 %v255_v31  ;;  %v257_v37 = vmax.f32 %v223_v32, 0.0 }
 0x144   :  { %v256_v35 = vmax.f32 %v218_v34, 0.0  ;;  %v598_v36 = vpop.f32.mrb[12].mxu0 }
 0x145   :  { %v233_v38 = vadd.f32 %v598_v36, %v480_v0  ;;  %v227_v39 = vpop.f32.mrb[13].mxu0 }
 0x146   :  { %v228_v40 = vadd.f32 %v480_v0, %v227_v39  ;;  %649 = vmatprep.mubr.f32.mxu1 %v256_v35 }
 0x147   :  { %650 = vmatmul.mubr.f32.gmra.mrb[10].mxu1 %v257_v37  ;;  %v259_v43 = vmax.f32 %v233_v38, 0.0 }
 0x148   :  { %v258_v41 = vmax.f32 %v228_v40, 0.0  ;;  %v601_v42 = vpop.f32.mrb[14].mxu0 }
 0x149   :  { %v243_v44 = vadd.f32 %v601_v42, %v480_v0  ;;  %v237_v45 = vpop.f32.mrb[15].mxu0 }
 0x14a   :  { %v238_v46 = vadd.f32 %v480_v0, %v237_v45  ;;  %652 = vmatprep.mubr.f32.mxu1 %v258_v41 }
 0x14b   :  { %653 = vmatmul.mubr.f32.gmra.mrb[12].mxu1 %v259_v43  ;;  %v261_v48 = vmax.f32 %v243_v44, 0.0 }
 0x14c   :  { %v260_v47 = vmax.f32 %v238_v46, 0.0 }
 0x14e   :  { %655 = vmatprep.mubr.f32.mxu1 %v260_v47 }
 0x14f   :  { %656 = vmatmul.mubr.f32.gmra.mrb[14].mxu1 %v261_v48 }
 0x206   :  { %v636_v50 = vpop.f32.mrb[0].mxu1 }
 0x207   :  { %v357_v51 = vadd.f32 %v636_v50, %v481_v49  ;;  %v351_v52 = vpop.f32.mrb[1].mxu1 }
 0x208   :  { %v352_v53 = vadd.f32 %v481_v49, %v351_v52 }
 0x209   :  { %v431_v54 = vmax.f32 %v357_v51, 0.0 }
 0x20a   :  { %v430_v55 = vmax.f32 %v352_v53, 0.0  ;;  %v639_v56 = vpop.f32.mrb[2].mxu1 }
 0x20b   :  { %447 = vst [vmem:[#allocation8 + $0x8] sm:$0xff] %v431_v54  ;;  %v367_v57 = vadd.f32 %v639_v56, %v481_v49  ;;  %v361_v58 = vpop.f32.mrb[3].mxu1 }
 0x20c   :  { %446 = vst [vmem:[#allocation8] sm:$0xff] %v430_v55  ;;  %v362_v59 = vadd.f32 %v481_v49, %v361_v58 }
 0x20d   :  { %v433_v60 = vmax.f32 %v367_v57, 0.0 }
 0x20e   :  { %v432_v61 = vmax.f32 %v362_v59, 0.0  ;;  %v642_v62 = vpop.f32.mrb[4].mxu1 }
 0x20f   :  { %449 = vst [vmem:[#allocation8 + $0x18] sm:$0xff] %v433_v60  ;;  %v377_v63 = vadd.f32 %v642_v62, %v481_v49  ;;  %v371_v0 = vpop.f32.mrb[5].mxu1 }
 0x210   :  { %448 = vst [vmem:[#allocation8 + $0x10] sm:$0xff] %v432_v61  ;;  %v372_v1 = vadd.f32 %v481_v49, %v371_v0 }
 0x211   :  { %v435_v2 = vmax.f32 %v377_v63, 0.0 }
 0x212   :  { %v434_v3 = vmax.f32 %v372_v1, 0.0  ;;  %v645_v4 = vpop.f32.mrb[6].mxu1 }
 0x213   :  { %451 = vst [vmem:[#allocation8 + $0x28] sm:$0xff] %v435_v2  ;;  %v387_v5 = vadd.f32 %v645_v4, %v481_v49  ;;  %v381_v6 = vpop.f32.mrb[7].mxu1 }
 0x214   :  { %450 = vst [vmem:[#allocation8 + $0x20] sm:$0xff] %v434_v3  ;;  %v382_v7 = vadd.f32 %v481_v49, %v381_v6 }
 0x215   :  { %v437_v8 = vmax.f32 %v387_v5, 0.0 }
 0x216   :  { %v436_v9 = vmax.f32 %v382_v7, 0.0  ;;  %v648_v10 = vpop.f32.mrb[8].mxu1 }
 0x217   :  { %453 = vst [vmem:[#allocation8 + $0x38] sm:$0xff] %v437_v8  ;;  %v397_v11 = vadd.f32 %v648_v10, %v481_v49  ;;  %v391_v12 = vpop.f32.mrb[9].mxu1 }
 0x218   :  { %452 = vst [vmem:[#allocation8 + $0x30] sm:$0xff] %v436_v9  ;;  %v392_v13 = vadd.f32 %v481_v49, %v391_v12 }
 0x219   :  { %v439_v14 = vmax.f32 %v397_v11, 0.0 }
 0x21a   :  { %v438_v15 = vmax.f32 %v392_v13, 0.0  ;;  %v651_v16 = vpop.f32.mrb[10].mxu1 }
 0x21b   :  { %455 = vst [vmem:[#allocation8 + $0x48] sm:$0xff] %v439_v14  ;;  %v407_v17 = vadd.f32 %v651_v16, %v481_v49  ;;  %v401_v18 = vpop.f32.mrb[11].mxu1 }
 0x21c   :  { %454 = vst [vmem:[#allocation8 + $0x40] sm:$0xff] %v438_v15  ;;  %v402_v19 = vadd.f32 %v481_v49, %v401_v18 }
 0x21d   :  { %v441_v20 = vmax.f32 %v407_v17, 0.0 }
 0x21e   :  { %v440_v21 = vmax.f32 %v402_v19, 0.0  ;;  %v654_v22 = vpop.f32.mrb[12].mxu1 }
 0x21f   :  { %457 = vst [vmem:[#allocation8 + $0x58] sm:$0xff] %v441_v20  ;;  %v417_v23 = vadd.f32 %v654_v22, %v481_v49  ;;  %v411_v24 = vpop.f32.mrb[13].mxu1 }
 0x220   :  { %456 = vst [vmem:[#allocation8 + $0x50] sm:$0xff] %v440_v21  ;;  %v412_v25 = vadd.f32 %v481_v49, %v411_v24 }
 0x221   :  { %v443_v26 = vmax.f32 %v417_v23, 0.0 }
 0x222   :  { %v442_v27 = vmax.f32 %v412_v25, 0.0  ;;  %v657_v28 = vpop.f32.mrb[14].mxu1 }
 0x223   :  { %459 = vst [vmem:[#allocation8 + $0x68] sm:$0xff] %v443_v26  ;;  %v427_v29 = vadd.f32 %v657_v28, %v481_v49  ;;  %v421_v30 = vpop.f32.mrb[15].mxu1 }
 0x224   :  { %458 = vst [vmem:[#allocation8 + $0x60] sm:$0xff] %v442_v27  ;;  %v422_v31 = vadd.f32 %v481_v49, %v421_v30 }
 0x225   :  { %v445_v32 = vmax.f32 %v427_v29, 0.0 }
 0x226   :  { %v444_v33 = vmax.f32 %v422_v31, 0.0 }
 0x227   :  { %461 = vst [vmem:[#allocation8 + $0x78] sm:$0xff] %v445_v32 }
 0x228   :  { %460 = vst [vmem:[#allocation8 + $0x70] sm:$0xff] %v444_v33 }
 0x229   :  { %805 = shalt.err (!%p802_p0)
}
 0x22a   :  { %s806_s12 = scalar_lea.hbm %s936_s5, 2048 }
 0x22b   :  { %p807_p1 = scmp.ne.s32.totalorder %s936_s5, %s806_s12  ;;  %p810_p2 = scmp.lt.u32.totalorder %s806_s12, %s936_s5 }
 0x22d   :  { %p812_p3 = pnand %p810_p2, %p807_p1 }
 0x22f   :  { %815 = shalt.err (!%p812_p3)
}
 0x230   :  { %473 = dma.vmem_to_hbm [thread:$0]  %s468_s8, 2048, %s936_s5, [#allocation4], %s824_s30, %s824_s30, %s825_s6  }
 0x231   :  { %820 = dma.done.wait [#allocation4], 2048  }
 0x232   :  { %821 = vsyncadd [#allocation4], 4294965248 }
 0x233   :  { %477 = vsyncpa [#allocation3], 1 }
 0x234   :  { %478 = vsyncpa [#allocation6], 1 }
 0x235   :  { %479 = vsyncpa [#allocation4], 1 }

</bundles_post_ra>
